<compile_context>
chip_gen: v7x
topology: tpu7x:2x2x1
jax: 0.10.0
libtpu: 0.0.40
codegen_flags: <defaults>
</compile_context>

<pallas_src>
import jax
import jax.numpy as jnp
from jax.experimental import pallas as pl
from jax.experimental.pallas import tpu as pltpu


def _critic_kernel(st_ref, w1t_ref, b1_ref, w2_ref, b2_ref, o_ref):
    # st_ref : [D, TM]   s^T tile (batch on lanes)
    # w1t_ref: [H, D]    W1^T, resident
    # b1_ref : [H, 1]    resident
    # w2_ref : [H, 1]    resident
    # b2_ref : [1, 1]    SMEM scalar
    # o_ref  : [1, TM]   lane-dense output row
    # Hidden layer on the MXU with f32 accumulation; bias + tanh in f32 (VPU/EUP).
    h = jnp.tanh(
        jnp.dot(w1t_ref[...], st_ref[...], preferred_element_type=jnp.float32)
        + b1_ref[...].astype(jnp.float32)
    )  # [H, TM]
    # Value head: VPU multiply + sublane reduce -> lane-dense [1, TM].
    v = jnp.sum(h * w2_ref[...].astype(jnp.float32), axis=0, keepdims=True)
    v = v + b2_ref[0, 0].astype(jnp.float32)
    o_ref[...] = v.astype(o_ref.dtype)


def critic_forward(s, w1, b1, w2, b2, *, tile_m=512, matmul_dtype=None):
    """Fused critic forward.

    s : [B, input_dim]
    w1: [input_dim, hidden], b1: [hidden], w2: [hidden], b2: scalar
    returns [B, 1]
    matmul_dtype: optionally jnp.bfloat16 to feed the MXU bf16 inputs (v6e/v7x).
    """
    B, D = s.shape
    H = w1.shape[1]
    out_dtype = s.dtype

    # Batch tile: multiple of 128 lanes; avoid over-padding tiny batches.
    tm = max(128, min(int(tile_m), pl.cdiv(B, 128) * 128))
    num_tiles = pl.cdiv(B, tm)
    b_pad = num_tiles * tm

    # Feature-major (lane-dense) layouts: batch on lanes, features on sublanes.
    st = jnp.transpose(s)                          # [D, B]
    if b_pad != B:
        st = jnp.pad(st, ((0, 0), (0, b_pad - B)))  # zero-pad -> tanh(b1), sliced off
    w1t = jnp.transpose(w1)                        # [H, D]
    if matmul_dtype is not None:
        st = st.astype(matmul_dtype)
        w1t = w1t.astype(matmul_dtype)
    b1c = b1.reshape(H, 1).astype(jnp.float32)
    w2c = w2.reshape(H, 1).astype(jnp.float32)
    b2s = jnp.asarray(b2, jnp.float32).reshape(1, 1)

    # VMEM budget: double-buffered s tile + output row, resident weights,
    # h intermediate; 4x headroom, clamped to the scoped default ceiling.
    itemsize = jnp.dtype(st.dtype).itemsize
    working = (2 * D * tm * itemsize          # s^T tile (double-buffered)
               + 2 * H * D * itemsize         # W1^T
               + 4 * H * 4                    # b1, w2
               + 2 * tm * 4                   # output row (double-buffered)
               + H * tm * 4)                  # h intermediate
    vmem_limit = int(min(max(4 * working, 4 * 1024 * 1024), 32 * 1024 * 1024))

    out = pl.pallas_call(
        _critic_kernel,
        out_shape=jax.ShapeDtypeStruct((1, b_pad), out_dtype),
        grid_spec=pltpu.PrefetchScalarGridSpec(
            num_scalar_prefetch=0,
            grid=(num_tiles,),
            in_specs=[
                pl.BlockSpec((D, tm), lambda i: (0, i)),   # s^T tile
                pl.BlockSpec((H, D), lambda i: (0, 0)),    # W1^T (resident)
                pl.BlockSpec((H, 1), lambda i: (0, 0)),    # b1   (resident)
                pl.BlockSpec((H, 1), lambda i: (0, 0)),    # w2   (resident)
                pl.BlockSpec(memory_space=pltpu.MemorySpace.SMEM),  # b2 scalar
            ],
            out_specs=pl.BlockSpec((1, tm), lambda i: (0, i)),
        ),
        compiler_params=pltpu.CompilerParams(
            dimension_semantics=("parallel",),
            vmem_limit_bytes=vmem_limit,
        ),
    )(st, w1t, b1c, w2c, b2s)

    return out[0, :B].reshape(B, 1)


def init_critic_params(key, input_dim, hidden=128, dtype=jnp.float32):
    """PyTorch nn.Linear-style init: U(-1/sqrt(fan_in), +1/sqrt(fan_in))."""
    k1, k2, k3, k4 = jax.random.split(key, 4)
    lim1 = 1.0 / (input_dim ** 0.5)
    lim2 = 1.0 / (hidden ** 0.5)
    w1 = jax.random.uniform(k1, (input_dim, hidden), dtype, -lim1, lim1)
    b1 = jax.random.uniform(k2, (hidden,), dtype, -lim1, lim1)
    w2 = jax.random.uniform(k3, (hidden,), dtype, -lim2, lim2)
    b2 = jax.random.uniform(k4, (), dtype, -lim2, lim2)
    return w1, b1, w2, b2


if __name__ == "__main__":
    key = jax.random.PRNGKey(0)
    k_in, k_par = jax.random.split(key)

    batch, input_dim, hidden = 8, 32, 128
    s = jax.random.normal(k_in, (batch, input_dim), jnp.float32)
    w1, b1, w2, b2 = init_critic_params(k_par, input_dim, hidden)

    ref = jnp.tanh(s @ w1 + b1[None, :]) @ w2.reshape(hidden, 1) + b2

    # f32 path
    out = jax.block_until_ready(critic_forward(s, w1, b1, w2, b2))
    assert out.shape == (batch, 1)
    assert jnp.allclose(out, ref, atol=1e-4, rtol=1e-4)

    # bf16 MXU-input path (v6e/v7x optimization); looser tolerance.
    out_bf16 = jax.block_until_ready(
        critic_forward(s, w1, b1, w2, b2, matmul_dtype=jnp.bfloat16))
    assert jnp.allclose(out_bf16, ref, atol=5e-2, rtol=5e-2)

    # Multi-tile grid + ragged batch (B not divisible by tile) exercise.
    s2 = jax.random.normal(k_in, (300, input_dim), jnp.float32)
    ref2 = jnp.tanh(s2 @ w1 + b1[None, :]) @ w2.reshape(hidden, 1) + b2
    out2 = jax.block_until_ready(critic_forward(s2, w1, b1, w2, b2, tile_m=128))
    assert out2.shape == (300, 1)
    assert jnp.allclose(out2, ref2, atol=1e-4, rtol=1e-4)

    print("KERNEL_OK")
</pallas_src>

<mosaic_0001>
module attributes {stable_mosaic.version = 11 : i64} {
  func.func @_critic_kernel(%arg0: i32, %arg1: memref<32x128xf32, #tpu.memory_space<vmem>>, %arg2: memref<128x32xf32, #tpu.memory_space<vmem>>, %arg3: memref<128x1xf32, #tpu.memory_space<vmem>>, %arg4: memref<128x1xf32, #tpu.memory_space<vmem>>, %arg5: memref<1x1xf32, #tpu.memory_space<smem>>, %arg6: memref<1x128xf32, #tpu.memory_space<vmem>>) attributes {dimension_semantics = [#tpu.dimension_semantics<parallel>], iteration_bounds = array<i64: 1>, scalar_prefetch = 0 : i64, scratch_operands = 0 : i64, tpu.core_type = #tpu.core_type<tc>, window_params = [{transform_indices = @transform_0, window_bounds = array<i64: 32, 128>}, {pipeline_mode = #tpu.pipeline_mode<synchronous>, transform_indices = @transform_1, window_bounds = array<i64: 128, 32>}, {pipeline_mode = #tpu.pipeline_mode<synchronous>, transform_indices = @transform_2, window_bounds = array<i64: 128, 1>}, {pipeline_mode = #tpu.pipeline_mode<synchronous>, transform_indices = @transform_3, window_bounds = array<i64: 128, 1>}, {transform_indices = @transform_4, window_bounds = array<i64: 1, 1>}, {transform_indices = @transform_5, window_bounds = array<i64: 1, 128>}]} {
    %c0 = arith.constant 0 : index
    %c0_0 = arith.constant 0 : index
    %0 = vector.load %arg2[%c0, %c0_0] : memref<128x32xf32, #tpu.memory_space<vmem>>, vector<128x32xf32>
    %c0_1 = arith.constant 0 : index
    %c0_2 = arith.constant 0 : index
    %1 = vector.load %arg1[%c0_1, %c0_2] : memref<32x128xf32, #tpu.memory_space<vmem>>, vector<32x128xf32>
    %cst = arith.constant dense<0.000000e+00> : vector<128x128xf32>
    %2 = tpu.matmul %0, %1, %cst {dimension_numbers = #tpu.dot_dimension_numbers<[1], [0], [0], [1], [0, 0, 1, 1], [], []>} : vector<128x32xf32>, vector<32x128xf32>, vector<128x128xf32> -> vector<128x128xf32>
    %c0_3 = arith.constant 0 : index
    %c0_4 = arith.constant 0 : index
    %3 = vector.load %arg3[%c0_3, %c0_4] : memref<128x1xf32, #tpu.memory_space<vmem>>, vector<128x1xf32>
    %4 = vector.broadcast %3 : vector<128x1xf32> to vector<128x128xf32>
    %5 = arith.addf %2, %4 : vector<128x128xf32>
    %6 = math.tanh %5 : vector<128x128xf32>
    %c0_5 = arith.constant 0 : index
    %c0_6 = arith.constant 0 : index
    %7 = vector.load %arg4[%c0_5, %c0_6] : memref<128x1xf32, #tpu.memory_space<vmem>>, vector<128x1xf32>
    %8 = vector.broadcast %7 : vector<128x1xf32> to vector<128x128xf32>
    %9 = arith.mulf %6, %8 : vector<128x128xf32>
    %cst_7 = arith.constant dense<0.000000e+00> : vector<128xf32>
    %10 = vector.multi_reduction <add>, %9, %cst_7 [0] : vector<128x128xf32> to vector<128xf32>
    %11 = vector.shape_cast %10 : vector<128xf32> to vector<1x128xf32>
    %c0_8 = arith.constant 0 : index
    %c0_9 = arith.constant 0 : index
    %12 = memref.load %arg5[%c0_8, %c0_9] : memref<1x1xf32, #tpu.memory_space<smem>>
    %13 = vector.broadcast %12 : f32 to vector<1x128xf32>
    %14 = arith.addf %11, %13 : vector<1x128xf32>
    %c0_10 = arith.constant 0 : index
    %c0_11 = arith.constant 0 : index
    %15 = vector.load %arg6[%c0_10, %c0_11] : memref<1x128xf32, #tpu.memory_space<vmem>>, vector<1x128xf32>
    tpu.vector_store %arg6[%c0_10, %c0_11], %14 {strides = array<i32>} : memref<1x128xf32, #tpu.memory_space<vmem>>, vector<1x128xf32>,
    return
  }
  func.func @transform_0(%arg0: i32) -> (i32, i32) {
    %c0_i32 = arith.constant 0 : i32
    %c0_i32_0 = arith.constant 0 : i32
    return %c0_i32, %arg0 : i32, i32
  }
  func.func @transform_1(%arg0: i32) -> (i32, i32) {
    %c0_i32 = arith.constant 0 : i32
    %c0_i32_0 = arith.constant 0 : i32
    %c0_i32_1 = arith.constant 0 : i32
    return %c0_i32, %c0_i32_0 : i32, i32
  }
  func.func @transform_2(%arg0: i32) -> (i32, i32) {
    %c0_i32 = arith.constant 0 : i32
    %c0_i32_0 = arith.constant 0 : i32
    %c0_i32_1 = arith.constant 0 : i32
    return %c0_i32, %c0_i32_0 : i32, i32
  }
  func.func @transform_3(%arg0: i32) -> (i32, i32) {
    %c0_i32 = arith.constant 0 : i32
    %c0_i32_0 = arith.constant 0 : i32
    %c0_i32_1 = arith.constant 0 : i32
    return %c0_i32, %c0_i32_0 : i32, i32
  }
  func.func @transform_4(%arg0: i32) -> (i32, i32) {
    %c0_i32 = arith.constant 0 : i32
    %c0_i32_0 = arith.constant 0 : i32
    %c0_i32_1 = arith.constant 0 : i32
    return %c0_i32, %c0_i32_0 : i32, i32
  }
  func.func @transform_5(%arg0: i32) -> (i32, i32) {
    %c0_i32 = arith.constant 0 : i32
    %c0_i32_0 = arith.constant 0 : i32
    return %c0_i32, %arg0 : i32, i32
  }
}

</mosaic_0001>

<bundles_post_ra>
// kernel: tpu_custom_call.1
= control target key start
LH: loop header
LB: loop body
LE: loop exit
PB: predicated region body
PF: predicated region fallthrough
CT: control target
= control target key end

     0   :  { %vm138_vm0 = vcmask 261120   ;;  %v639_v7 = vmov 0   ;;  %s861_s0 = inlined_call_operand.vmem [shape: f32[32,128], index: 0, kind: input, shape index: {}]   ;;  %s862_s1 = inlined_call_operand.vmem [shape: f32[128,32], index: 1, kind: input, shape index: {}]   ;;  %s863_s2 = inlined_call_operand.vmem [shape: f32[128,1], index: 2, kind: input, shape index: {}]   ;;  %s864_s3 = inlined_call_operand.vmem [shape: f32[128,1], index: 3, kind: input, shape index: {}]   ;;  %s865_s4 = inlined_call_operand.<no memory space> [shape: f32[1,1], index: 4, kind: input, shape index: {}]   ;;  %s866_s5 = inlined_call_operand.hbm [shape: f32[1,128], index: 5, kind: output, shape index: {}]  }
   0x1   :  { %v38_v0 = vld [vmem:[%s861_s0] sm:$0xff]  ;;  %v39_v1 = vld [vmem:[%s861_s0 + $0x8] sm:$0xff]  ;;  %v40_v2 = vld [vmem:[%s861_s0 + $0x10] sm:$0xff]  ;;  %581 = vset.pattern.permute.xlu0 %v639_v7  ;;  %582 = vset.pattern.permute.xlu1 %v639_v7 }
   0x2   :  { %v567_v3 = vpack.c.bf16 %v39_v1, %v38_v0  ;;  %v41_v4 = vld [vmem:[%s861_s0 + $0x18] sm:$0xff]  ;;  %v22_v5 = vld [vmem:[%s862_s1] sm:$0xff]  ;;  %v44_v10 = vld [vmem:[%s863_s2 + $0x10] sm:$0xff] }
   0x3   :  { %v30_v6 = vld [vmem:[%s862_s1 + $0x40] sm:$0xff]  ;;  %v571_v8 = vpack.c.bf16 %v41_v4, %v40_v2  ;;  %543 = vmatprep.mubr.msk.f32.mxu0 %vm138_vm0, %v22_v5  ;;  %70 = vperm.xlu1 %582, %v44_v10   ;;  %v43_v11 = vld [vmem:[%s863_s2 + $0x8] sm:$0xff]  ;;  %v45_v12 = vld [vmem:[%s863_s2 + $0x18] sm:$0xff] }
   0x4   :  { %555 = vmatprep.mubr.msk.f32.mxu1 %vm138_vm0, %v30_v6  ;;  %568 = vmatprep.subr.bf16.mxu0 %v567_v3  ;;  %v42_v9 = vld [vmem:[%s863_s2] sm:$0xff]  ;;  %v23_v13 = vld [vmem:[%s862_s1 + $0x8] sm:$0xff]  ;;  %v24_v15 = vld [vmem:[%s862_s1 + $0x10] sm:$0xff] }
   0x5   :  { %575 = vmatprep.subr.bf16.mxu1 %v567_v3  ;;  %570 = vmatpush3.bf16.msra.mxu0 %v567_v3  ;;  %v31_v14 = vld [vmem:[%s862_s1 + $0x48] sm:$0xff]  ;;  %v32_v16 = vld [vmem:[%s862_s1 + $0x50] sm:$0xff]  ;;  %v46_v17 = vld [vmem:[%s863_s2 + $0x20] sm:$0xff] }
   0x6   :  { %577 = vmatpush3.bf16.msra.mxu1 %v567_v3  ;;  %572 = vmatprep.subr.bf16.mxu0 %v571_v8  ;;  %v47_v18 = vld [vmem:[%s863_s2 + $0x28] sm:$0xff]  ;;  %v25_v19 = vld [vmem:[%s862_s1 + $0x18] sm:$0xff]  ;;  %v26_v21 = vld [vmem:[%s862_s1 + $0x20] sm:$0xff] }
   0x7   :  { %576 = vmatprep.subr.bf16.mxu1 %v571_v8  ;;  %60 = vperm.xlu0 %581, %v42_v9   ;;  %v33_v20 = vld [vmem:[%s862_s1 + $0x58] sm:$0xff]  ;;  %v34_v22 = vld [vmem:[%s862_s1 + $0x60] sm:$0xff]  ;;  %v48_v23 = vld [vmem:[%s863_s2 + $0x30] sm:$0xff] }
   0x8   :  { %75 = vperm.xlu1 %582, %v45_v12   ;;  %v49_v24 = vld [vmem:[%s863_s2 + $0x38] sm:$0xff]  ;;  %v27_v25 = vld [vmem:[%s862_s1 + $0x28] sm:$0xff]  ;;  %v28_v27 = vld [vmem:[%s862_s1 + $0x30] sm:$0xff] }
   0x9   :  { %574 = vmatpush3.bf16.msra.mxu0 %v571_v8  ;;  %v35_v26 = vld [vmem:[%s862_s1 + $0x68] sm:$0xff]  ;;  %v36_v28 = vld [vmem:[%s862_s1 + $0x70] sm:$0xff] }
   0xa   :  { %578 = vmatpush3.bf16.msra.mxu1 %v571_v8 }
   0xb   :  { %65 = vperm.xlu0 %581, %v43_v11  }
   0xc   :  { %544 = vmatmul.mubr.msk.f32.vlgmr.msra.gmra.mrb[0].mxu0 %vm138_vm0, %v23_v13  ;;  %85 = vperm.xlu1 %582, %v47_v18  }
   0xd   :  { %556 = vmatmul.mubr.msk.f32.vlgmr.msra.gmra.mrb[0].mxu1 %vm138_vm0, %v31_v14  ;;  %546 = vmatprep.mubr.msk.f32.mxu0 %vm138_vm0, %v24_v15 }
   0xe   :  { %558 = vmatprep.mubr.msk.f32.mxu1 %vm138_vm0, %v32_v16 }
   0xf   :  { %80 = vperm.xlu0 %581, %v46_v17  }
  0x10   :  { %547 = vmatmul.mubr.msk.f32.gmra.mrb[2].mxu0 %vm138_vm0, %v25_v19 }
  0x11   :  { %559 = vmatmul.mubr.msk.f32.gmra.mrb[2].mxu1 %vm138_vm0, %v33_v20  ;;  %549 = vmatprep.mubr.msk.f32.mxu0 %vm138_vm0, %v26_v21 }
  0x12   :  { %561 = vmatprep.mubr.msk.f32.mxu1 %vm138_vm0, %v34_v22 }
  0x13   :  { %11 = vsyncpa [#allocation4], 0  ;;  %90 = vperm.xlu0 %581, %v48_v23   ;;  %95 = vperm.xlu1 %582, %v49_v24   ;;  %v348_v29 = vld [vmem:[%s864_s3] sm:$0xff]  ;;  %v349_v30 = vld [vmem:[%s864_s3 + $0x8] sm:$0xff]  ;;  %s640_s16 = smov [#allocation3]  }
  0x14   :  { %550 = vmatmul.mubr.msk.f32.gmra.mrb[4].mxu0 %vm138_vm0, %v27_v25  ;;  %v29_v31 = vld [vmem:[%s862_s1 + $0x38] sm:$0xff]  ;;  %v50_v33 = vld [vmem:[%s863_s2 + $0x40] sm:$0xff]  ;;  %v350_v34 = vld [vmem:[%s864_s3 + $0x10] sm:$0xff]  ;;  %s491_s17 = sshll.u32 %s640_s16, 4  ;;  %s492_s17 = int_to_ptr.vmem [resolvable:$true] %s491_s17 }
  0x15   :  { %562 = vmatmul.mubr.msk.f32.gmra.mrb[4].mxu1 %vm138_vm0, %v35_v26  ;;  %552 = vmatprep.mubr.msk.f32.mxu0 %vm138_vm0, %v28_v27  ;;  %v37_v32 = vld [vmem:[%s862_s1 + $0x78] sm:$0xff]  ;;  %v51_v35 = vld [vmem:[%s863_s2 + $0x48] sm:$0xff]  ;;  %v52_v37 = vld [vmem:[%s863_s2 + $0x50] sm:$0xff]  ;;  %s615_s18 = scalar_lea.vmem %s492_s17, 16  ;;  %s619_s19 = scalar_lea.vmem %s492_s17, 32 }
  0x16   :  { %564 = vmatprep.mubr.msk.f32.mxu1 %vm138_vm0, %v36_v28  ;;  %v351_v36 = vld [vmem:[%s864_s3 + $0x18] sm:$0xff]  ;;  %v352_v38 = vld [vmem:[%s864_s3 + $0x20] sm:$0xff]  ;;  %v353_v40 = vld [vmem:[%s864_s3 + $0x28] sm:$0xff]  ;;  %p616_p0 = scmp.ne.s32.totalorder %s492_s17, %s615_s18  ;;  %p620_p1 = scmp.lt.s32.totalorder %s492_s17, %s492_s17 }
  0x17   :  { %366 = vperm.xlu0 %581, %v348_v29   ;;  %371 = vperm.xlu1 %582, %v349_v30   ;;  %v53_v39 = vld [vmem:[%s863_s2 + $0x58] sm:$0xff]  ;;  %v54_v41 = vld [vmem:[%s863_s2 + $0x60] sm:$0xff]  ;;  %v354_v42 = vld [vmem:[%s864_s3 + $0x30] sm:$0xff]  ;;  %p621_p2 = scmp.lt.s32.totalorder %s619_s19, %s615_s18 }
  0x18   :  { %553 = vmatmul.mubr.msk.f32.gmra.mrb[6].mxu0 %vm138_vm0, %v29_v31  ;;  %v55_v43 = vld [vmem:[%s863_s2 + $0x68] sm:$0xff]  ;;  %v355_v44 = vld [vmem:[%s864_s3 + $0x38] sm:$0xff]  ;;  %v56_v45 = vld [vmem:[%s863_s2 + $0x70] sm:$0xff] }
  0x19   :  { %565 = vmatmul.mubr.msk.f32.gmra.mrb[6].mxu1 %vm138_vm0, %v37_v32  ;;  %v356_v46 = vld [vmem:[%s864_s3 + $0x40] sm:$0xff]  ;;  %v57_v47 = vld [vmem:[%s863_s2 + $0x78] sm:$0xff]  ;;  %v357_v48 = vld [vmem:[%s864_s3 + $0x48] sm:$0xff]  ;;  %p622_p3 = por %p621_p2, %p620_p1 }
  0x1a   :  { %v358_v49 = vld [vmem:[%s864_s3 + $0x50] sm:$0xff]  ;;  %v359_v50 = vld [vmem:[%s864_s3 + $0x58] sm:$0xff]  ;;  %v360_v51 = vld [vmem:[%s864_s3 + $0x60] sm:$0xff] }
  0x1b   :  { %100 = vperm.xlu0 %581, %v50_v33   ;;  %376 = vperm.xlu1 %582, %v350_v34   ;;  %v361_v52 = vld [vmem:[%s864_s3 + $0x68] sm:$0xff]  ;;  %v362_v53 = vld [vmem:[%s864_s3 + $0x70] sm:$0xff]  ;;  %v363_v54 = vld [vmem:[%s864_s3 + $0x78] sm:$0xff]  ;;  %p623_p4 = pnand %p622_p3, %p616_p0 }
  0x1f   :  { %105 = vperm.xlu0 %581, %v51_v35   ;;  %381 = vperm.xlu1 %582, %v351_v36  }
  0x23   :  { %110 = vperm.xlu0 %581, %v52_v37   ;;  %386 = vperm.xlu1 %582, %v352_v38  }
  0x27   :  { %115 = vperm.xlu0 %581, %v53_v39   ;;  %391 = vperm.xlu1 %582, %v353_v40  }
  0x2b   :  { %120 = vperm.xlu0 %581, %v54_v41   ;;  %396 = vperm.xlu1 %582, %v354_v42  }
  0x2f   :  { %125 = vperm.xlu0 %581, %v55_v43   ;;  %401 = vperm.xlu1 %582, %v355_v44  }
  0x33   :  { %130 = vperm.xlu0 %581, %v56_v45   ;;  %406 = vperm.xlu1 %582, %v356_v46  }
  0x37   :  { %135 = vperm.xlu0 %581, %v57_v47   ;;  %411 = vperm.xlu1 %582, %v357_v48  }
  0x3b   :  { %416 = vperm.xlu0 %581, %v358_v49   ;;  %421 = vperm.xlu1 %582, %v359_v50  }
  0x3f   :  { %426 = vperm.xlu0 %581, %v360_v51   ;;  %431 = vperm.xlu1 %582, %v361_v52  }
  0x43   :  { %436 = vperm.xlu0 %581, %v362_v53   ;;  %441 = vperm.xlu1 %582, %v363_v54  }
  0x82   :  { %v71_v56 = vpop.permute.xlu1 %70 }
  0x86   :  { %v61_v55 = vpop.permute.xlu0 %60 }
  0x87   :  { %v76_v58 = vpop.permute.xlu1 %75 }
  0x8a   :  { %v66_v57 = vpop.permute.xlu0 %65 }
  0x8b   :  { %v86_v60 = vpop.permute.xlu1 %85 }
  0x8e   :  { %v81_v59 = vpop.permute.xlu0 %80 }
  0x92   :  { %v91_v61 = vpop.permute.xlu0 %90  ;;  %v96_v62 = vpop.permute.xlu1 %95 }
  0x96   :  { %v367_v63 = vpop.permute.xlu0 %366  ;;  %v372_v0 = vpop.permute.xlu1 %371 }
  0x9a   :  { %v101_v1 = vpop.permute.xlu0 %100  ;;  %v377_v2 = vpop.permute.xlu1 %376 }
  0x9e   :  { %v106_v3 = vpop.permute.xlu0 %105  ;;  %v382_v4 = vpop.permute.xlu1 %381 }
  0xa2   :  { %v111_v5 = vpop.permute.xlu0 %110  ;;  %v387_v6 = vpop.permute.xlu1 %386 }
  0xa6   :  { %v116_v7 = vpop.permute.xlu0 %115  ;;  %v843_v8 = vpop.permute.xlu1 %391 }
  0xaa   :  { %v121_v15 = vpop.permute.xlu0 %120  ;;  %v397_v22 = vpop.permute.xlu1 %396 }
  0xae   :  { %v126_v29 = vpop.permute.xlu0 %125  ;;  %v402_v39 = vpop.permute.xlu1 %401 }
  0xb2   :  { %v131_v46 = vpop.permute.xlu0 %130  ;;  %v407_v49 = vpop.permute.xlu1 %406 }
  0xdf   :  { %v545_v9 = vpop.f32.mrb[0].mxu0 }
  0xe0   :  { %v557_v10 = vpop.f32.mrb[0].mxu1  ;;  %v259_v11 = vadd.f32 %v545_v9, %v66_v57  ;;  %v253_v12 = vpop.f32.mrb[1].mxu0 }
  0xe1   :  { %v293_v13 = vpop.f32.mrb[1].mxu1  ;;  %v254_v14 = vadd.f32 %v253_v12, %v61_v55  ;;  %v299_v42 = vadd.f32 %v557_v10, %v106_v3 }
  0xe2   :  { %583 = vtanh.f32 %v259_v11  ;;  %v294_v40 = vadd.f32 %v293_v13, %v101_v1 }
  0xe3   :  { %v548_v16 = vpop.f32.mrb[2].mxu0  ;;  %585 = vtanh.f32 %v254_v14 }
  0xe4   :  { %v560_v17 = vpop.f32.mrb[2].mxu1  ;;  %v269_v18 = vadd.f32 %v548_v16, %v76_v58  ;;  %v263_v19 = vpop.f32.mrb[3].mxu0 }
  0xe5   :  { %v303_v20 = vpop.f32.mrb[3].mxu1  ;;  %v264_v21 = vadd.f32 %v263_v19, %v71_v56  ;;  %v309_v50 = vadd.f32 %v560_v17, %v116_v7  ;;  %v136_v58 = vpop.permute.xlu0 %135 }
  0xe6   :  { %587 = vtanh.f32 %v269_v18  ;;  %v304_v47 = vadd.f32 %v303_v20, %v111_v5 }
  0xe7   :  { %v551_v23 = vpop.f32.mrb[4].mxu0  ;;  %589 = vtanh.f32 %v264_v21 }
  0xe8   :  { %v563_v24 = vpop.f32.mrb[4].mxu1  ;;  %v279_v25 = vadd.f32 %v551_v23, %v86_v60  ;;  %v273_v26 = vpop.f32.mrb[5].mxu0 }
  0xe9   :  { %v313_v27 = vpop.f32.mrb[5].mxu1  ;;  %v274_v28 = vadd.f32 %v273_v26, %v81_v59  ;;  %v319_v59 = vadd.f32 %v563_v24, %v126_v29  ;;  %v417_v10 = vpop.permute.xlu0 %416 }
  0xea   :  { %591 = vtanh.f32 %v279_v25  ;;  %v314_v55 = vadd.f32 %v313_v27, %v121_v15 }
  0xeb   :  { %v554_v30 = vpop.f32.mrb[6].mxu0  ;;  %593 = vtanh.f32 %v274_v28 }
  0xec   :  { %v566_v31 = vpop.f32.mrb[6].mxu1  ;;  %v584_v32 = vpop.eup %583  ;;  %v289_v33 = vadd.f32 %v554_v30, %v96_v62 }
  0xed   :  { %v283_v34 = vpop.f32.mrb[7].mxu0  ;;  %v323_v35 = vpop.f32.mrb[7].mxu1  ;;  %v445_v36 = vmul.f32 %v584_v32, %v372_v0  ;;  %v329_v5 = vadd.f32 %v566_v31, %v136_v58 }
  0xee   :  { %v284_v37 = vadd.f32 %v283_v34, %v91_v61  ;;  %v586_v38 = vpop.eup %585  ;;  %595 = vtanh.f32 %v289_v33  ;;  %v412_v0 = vpop.permute.xlu1 %411  ;;  %v324_v1 = vadd.f32 %v323_v35, %v131_v46 }
  0xef   :  { %v444_v41 = vmul.f32 %v586_v38, %v367_v63  ;;  %v427_v20 = vpop.permute.xlu0 %426 }
  0xf0   :  { %597 = vtanh.f32 %v284_v37  ;;  %v588_v43 = vpop.eup %587 }
  0xf1   :  { %v460_v44 = vadd.f32 %v445_v36, %v444_v41  ;;  %v590_v45 = vpop.eup %589  ;;  %599 = vtanh.f32 %v294_v40  ;;  %v447_v52 = vmul.f32 %v588_v43, %v382_v4  ;;  %v482_v43 = vstv %s865_s4 }
  0xf2   :  { %v446_v48 = vmul.f32 %v590_v45, %v377_v2  ;;  %601 = vtanh.f32 %v299_v42  ;;  %v422_v14 = vpop.permute.xlu1 %421 }
  0xf3   :  { %603 = vtanh.f32 %v304_v47  ;;  %v437_v31 = vpop.permute.xlu0 %436 }
  0xf4   :  { %v592_v51 = vpop.eup %591  ;;  %v461_v53 = vadd.f32 %v460_v44, %v446_v48  ;;  %605 = vtanh.f32 %v309_v50 }
  0xf5   :  { %v594_v54 = vpop.eup %593  ;;  %v449_v61 = vmul.f32 %v592_v51, %v843_v8  ;;  %607 = vtanh.f32 %v314_v55 }
  0xf6   :  { %v448_v56 = vmul.f32 %v594_v54, %v387_v6  ;;  %v462_v57 = vadd.f32 %v461_v53, %v447_v52  ;;  %609 = vtanh.f32 %v319_v59  ;;  %v432_v24 = vpop.permute.xlu1 %431 }
  0xf7   :  { %611 = vtanh.f32 %v324_v1 }
  0xf8   :  { %v596_v60 = vpop.eup %595  ;;  %v463_v62 = vadd.f32 %v462_v57, %v448_v56  ;;  %613 = vtanh.f32 %v329_v5 }
  0xf9   :  { %v451_v7 = vmul.f32 %v596_v60, %v402_v39 }
  0xfa   :  { %v598_v63 = vpop.eup %597  ;;  %v464_v3 = vadd.f32 %v463_v62, %v449_v61  ;;  %v442_v34 = vpop.permute.xlu1 %441 }
  0xfb   :  { %v450_v2 = vmul.f32 %v598_v63, %v397_v22  ;;  %v600_v4 = vpop.eup %599 }
  0xfc   :  { %v602_v6 = vpop.eup %601  ;;  %v452_v11 = vmul.f32 %v600_v4, %v407_v49 }
  0xfd   :  { %v465_v9 = vadd.f32 %v464_v3, %v450_v2  ;;  %v604_v13 = vpop.eup %603  ;;  %v453_v8 = vmul.f32 %v602_v6, %v412_v0 }
  0xfe   :  { %v606_v16 = vpop.eup %605  ;;  %v454_v17 = vmul.f32 %v604_v13, %v417_v10 }
  0xff   :  { %v466_v12 = vadd.f32 %v465_v9, %v451_v7  ;;  %v608_v19 = vpop.eup %607  ;;  %v455_v21 = vmul.f32 %v606_v16, %v422_v14 }
 0x100   :  { %v610_v23 = vpop.eup %609  ;;  %v456_v25 = vmul.f32 %v608_v19, %v427_v20 }
 0x101   :  { %v467_v15 = vadd.f32 %v466_v12, %v452_v11  ;;  %v612_v27 = vpop.eup %611  ;;  %v457_v28 = vmul.f32 %v610_v23, %v432_v24 }
 0x102   :  { %v614_v30 = vpop.eup %613  ;;  %v458_v32 = vmul.f32 %v612_v27, %v437_v31 }
 0x103   :  { %v468_v18 = vadd.f32 %v467_v15, %v453_v8  ;;  %v459_v35 = vmul.f32 %v614_v30, %v442_v34 }
 0x105   :  { %v469_v22 = vadd.f32 %v468_v18, %v454_v17 }
 0x107   :  { %v470_v26 = vadd.f32 %v469_v22, %v455_v21 }
 0x109   :  { %v471_v29 = vadd.f32 %v470_v26, %v456_v25 }
 0x10b   :  { %v472_v33 = vadd.f32 %v471_v29, %v457_v28 }
 0x10d   :  { %v473_v36 = vadd.f32 %v472_v33, %v458_v32 }
 0x10f   :  { %v474_v37 = vadd.f32 %v473_v36, %v459_v35 }
 0x111   :  { %v475_v38 = vrot.slane %v474_v37, 4 }
 0x113   :  { %v476_v39 = vadd.f32 %v475_v38, %v474_v37 }
 0x115   :  { %v477_v40 = vrot.slane %v476_v39, 2 }
 0x117   :  { %v478_v41 = vadd.f32 %v477_v40, %v476_v39 }
 0x119   :  { %v479_v42 = vrot.slane %v478_v41, 1 }
 0x11b   :  { %v480_v44 = vadd.f32 %v479_v42, %v478_v41 }
 0x11d   :  { %v483_v45 = vadd.f32 %v482_v43, %v480_v44 }
 0x11f   :  { %484 = vst [vmem:[#allocation3] sm:$0x1] %v483_v45 }
 0x120   :  { %626 = shalt.err (!%p623_p4)
}
 0x121   :  { %s627_s22 = scalar_lea.hbm %s866_s5, 16 }
 0x122   :  { %p628_p5 = scmp.ne.s32.totalorder %s866_s5, %s627_s22  ;;  %p631_p6 = scmp.lt.u32.totalorder %s627_s22, %s866_s5 }
 0x124   :  { %p633_p7 = pnand %p631_p6, %p628_p5 }
 0x126   :  { %636 = shalt.err (!%p633_p7)
}
 0x127   :  { %494 = dma.vmem_to_hbm [thread:$0]  %s492_s17, 16, %s866_s5, [#allocation4]  }
 0x128   :  { %637 = dma.done.wait [#allocation4], 16  }
 0x129   :  { %638 = vsyncadd [#allocation4], 4294967280 }
 0x12a   :  { %498 = vsyncpa [#allocation4], 1 }

</bundles_post_ra>
